<compile_context>
chip_gen: v7x
topology: tpu7x:2x2x1
jax: 0.10.0
libtpu: 0.0.40
codegen_flags: <defaults>
</compile_context>

<pallas_src>
import functools

import jax
import jax.numpy as jnp
from jax import lax
from jax.experimental import pallas as pl
from jax.experimental.pallas import tpu as pltpu


def _leaky(x):
    return jnp.where(x > 0, x, 0.1 * x)


def _csp_kernel(x_ref, w12_ref, b12_ref, w3_ref, b3_ref,
                wf1_ref, wf2_ref, bf_ref, o_ref, *, H, WH):
    nb = x_ref.shape[0]            # batch elements in this grid step
    M = nb * H                     # rows (sublane axis)
    kin = x_ref.shape[-1]          # padded W * Cin  (lane axis of the input)
    wout = o_ref.shape[-1]         # W * Cout        (lane axis of the output)

    # (nb, H, W*Cin) -> (nb*H, W*Cin): layout-free merge into the sublane axis.
    xb = x_ref[...].reshape(M, kin)

    # part1 stage-1 and part2 1x1 convs fused into ONE bf16 matmul (+ folded
    # BN, LeakyReLU).  Lanes [0, WH) hold the part1 branch, [WH, 2*WH) part2.
    y12 = _leaky(jnp.dot(xb.astype(jnp.bfloat16), w12_ref[...],
                         preferred_element_type=jnp.float32) + b12_ref[...])
    y1 = y12[:, :WH]
    y2 = y12[:, WH:]

    # Row index within each image as a (M, 1) column; the two boundary masks
    # below ARE the 3x3 conv's zero padding along H (each image occupies
    # exactly H contiguous sublanes of the block).
    hh = lax.broadcasted_iota(jnp.int32, (M, 1), 0) % H

    # part1 stage-2: 3x3 "same" conv + BN + LeakyReLU.  kx taps are folded
    # into the banded block weights w3_ref[ky]; ky taps are sublane rolls of
    # y1 (XLU slot) with the invalid boundary rows zeroed.  No scratch.
    acc = jnp.dot(y1.astype(jnp.bfloat16), w3_ref[1],
                  preferred_element_type=jnp.float32)                    # ky = 1
    up = jnp.where(hh > 0, pltpu.roll(y1, shift=1, axis=0), 0.0)         # ky = 0
    acc = acc + jnp.dot(up.astype(jnp.bfloat16), w3_ref[0],
                        preferred_element_type=jnp.float32)
    dn = jnp.where(hh < H - 1, pltpu.roll(y1, shift=M - 1, axis=0), 0.0)  # ky = 2
    acc = acc + jnp.dot(dn.astype(jnp.bfloat16), w3_ref[2],
                        preferred_element_type=jnp.float32)
    y1b = _leaky(acc + b3_ref[...])

    # final 1x1 conv on concat([part1, part2]) + BN + LeakyReLU.  The concat
    # is avoided by splitting the weight over the two branches.
    out = _leaky(jnp.dot(y1b.astype(jnp.bfloat16), wf1_ref[...],
                         preferred_element_type=jnp.float32)
                 + jnp.dot(y2.astype(jnp.bfloat16), wf2_ref[...],
                           preferred_element_type=jnp.float32)
                 + bf_ref[...])

    # (nb*H, W*Cout) -> (nb, H, W*Cout): layout-free split; lane-dense store.
    o_ref[...] = out.reshape(nb, H, wout)


def _pick_batch_block(N, H, kin, wout, weight_bytes, vmem_limit, row_target=512):
    """Largest divisor of N with M = nb*H near row_target and fitting VMEM."""
    def fits(nb):
        act = nb * H * (kin + wout) * 4           # f32 activation blocks
        return 2 * act + 2 * weight_bytes < int(0.6 * vmem_limit)

    cap = max(1, min(N, max(1, row_target // max(H, 1))))
    nb = 1
    for cand in range(cap, 0, -1):
        if N % cand == 0 and fits(cand):
            nb = cand
            break
    # Keep >= 2 grid steps when possible so v7x can shard the "parallel"
    # batch axis across its two TensorCores (negligible loss on single-TC
    # v5e/v6e at these block sizes).
    if N > 1 and nb == N:
        for cand in range(N // 2, 0, -1):
            if N % cand == 0:
                nb = cand
                break
    return nb


def csp_block_pallas(x_nchw, packed_params, *, batch_block=None):
    (w12, b12, w3band, b3b, wf1, wf2, bfb) = packed_params
    N, Cin, H, W = x_nchw.shape
    WO = wf1.shape[1]              # W * Cout
    Cout = WO // W
    KIN = w12.shape[0]             # W * Cin padded up to a multiple of 128
    WH = w3band.shape[-1]          # W * hidden

    # NCHW -> NHWC -> lane-packed (N, H, W*Cin): layout plumbing in XLA.
    # TODO(synk): when chaining CSP blocks, keep activations lane-packed
    # across blocks so these HBM transpose passes amortize away.
    x = jnp.transpose(x_nchw, (0, 2, 3, 1)).astype(jnp.float32)
    x = x.reshape(N, H, W * Cin)
    if KIN != W * Cin:             # pad lanes to a multiple of 128 (w12 has zero rows there)
        x = jnp.pad(x, ((0, 0), (0, 0), (0, KIN - W * Cin)))

    weight_bytes = sum(int(a.size) * a.dtype.itemsize
                       for a in (w12, b12, w3band, b3b, wf1, wf2, bfb))

    try:
        vmem_cap = int(pltpu.get_tpu_info().vmem_capacity_bytes)
    except Exception:
        vmem_cap = 64 * 1024 * 1024
    # ~96 MiB on 128-MiB chips (v5e/v6e), ~48 MiB on 64-MiB v7x.
    vmem_limit = min(max(32 * 1024 * 1024, (vmem_cap * 3) // 4),
                     100 * 1024 * 1024)

    nb = batch_block or _pick_batch_block(N, H, KIN, WO, weight_bytes, vmem_limit)
    assert N % nb == 0

    def const_spec(a):
        # Full-array block with a constant index_map (no re-DMA across steps).
        # TODO(synk): try pipeline_mode=pl.Buffered(1) here to single-buffer
        # the constant weights when VMEM-bound on v7x.
        return pl.BlockSpec(a.shape, lambda n, nd=a.ndim: (0,) * nd)

    # TODO(synk): for very large H*W images (or WH = W*hid beyond ~1024, where
    # the W^2*C^2 banded weights outgrow VMEM), tile the grid over rows with a
    # genuine 1-row halo and fall back to a channels-on-lanes NHWC layout.
    kernel = functools.partial(_csp_kernel, H=H, WH=WH)
    out = pl.pallas_call(
        kernel,
        out_shape=jax.ShapeDtypeStruct((N, H, WO), jnp.float32),
        grid_spec=pltpu.PrefetchScalarGridSpec(
            num_scalar_prefetch=0,
            grid=(N // nb,),
            in_specs=[
                pl.BlockSpec((nb, H, KIN), lambda n: (n, 0, 0)),
                const_spec(w12), const_spec(b12),
                const_spec(w3band), const_spec(b3b),
                const_spec(wf1), const_spec(wf2), const_spec(bfb),
            ],
            out_specs=pl.BlockSpec((nb, H, WO), lambda n: (n, 0, 0)),
        ),
        compiler_params=pltpu.CompilerParams(
            dimension_semantics=("parallel",),
            vmem_limit_bytes=int(vmem_limit)),
    )(x, w12, b12, w3band, b3b, wf1, wf2, bfb)

    # lane-packed (N, H, W*Cout) -> NHWC -> NCHW
    return jnp.transpose(out.reshape(N, H, W, Cout), (0, 3, 1, 2))


# ------------- parameter construction (deterministic, BN folded, packed) -------------

def _folded_conv_bn(key, kh, kw, cin, cout, eps=1e-5):
    k1, k2, k3, k4, k5 = jax.random.split(key, 5)
    w = 0.1 * jax.random.normal(k1, (kh, kw, cin, cout), jnp.float32)  # HWIO
    gamma = 1.0 + 0.1 * jax.random.normal(k2, (cout,), jnp.float32)
    beta = 0.1 * jax.random.normal(k3, (cout,), jnp.float32)
    mean = 0.1 * jax.random.normal(k4, (cout,), jnp.float32)
    var = 0.5 + 0.1 * jnp.abs(jax.random.normal(k5, (cout,), jnp.float32))
    scale = gamma / jnp.sqrt(var + eps)
    return w * scale, beta - mean * scale  # folded weight (HWIO), folded bias (cout,)


def make_csp_params(key, in_channels, out_channels, W):
    hid = out_channels // 2
    k1, k2, k3, k4 = jax.random.split(key, 4)
    w1_hwio, b1 = _folded_conv_bn(k1, 1, 1, in_channels, hid)
    w3_hwio, b3 = _folded_conv_bn(k2, 3, 3, hid, hid)
    w2_hwio, b2 = _folded_conv_bn(k3, 1, 1, in_channels, hid)
    wf_hwio, bf = _folded_conv_bn(k4, 1, 1, 2 * hid, out_channels)

    w1 = w1_hwio.reshape(in_channels, hid)
    w2 = w2_hwio.reshape(in_channels, hid)
    wf = wf_hwio.reshape(2 * hid, out_channels)

    eyeW = jnp.eye(W, dtype=jnp.float32)
    WH = W * hid

    def block_diag(w):  # (cin, cout) -> (W*cin, W*cout): per-pixel 1x1 conv
        cin, cout = w.shape
        return jnp.einsum('io,wv->wivo', w, eyeW).reshape(W * cin, W * cout)

    # fused part1-stage1 / part2 1x1 conv weight: lanes [0,WH)=y1, [WH,2WH)=y2.
    # Input rows padded with zeros so W*Cin is lane-dense (multiple of 128).
    w12 = jnp.concatenate([block_diag(w1), block_diag(w2)], axis=1)  # (W*Cin, 2*WH)
    kin = W * in_channels
    kin_pad = -(-kin // 128) * 128
    if kin_pad != kin:
        w12 = jnp.concatenate(
            [w12, jnp.zeros((kin_pad - kin, 2 * WH), jnp.float32)], axis=0)
    b12 = jnp.concatenate([jnp.tile(b1, W), jnp.tile(b2, W)]).reshape(1, 2 * WH)

    # 3x3 conv: one banded (WH, WH) block matrix per ky tap (kx folded into
    # the band) -- no zero halves, the kernel feeds the y1 slice directly.
    bands = []
    for ky in range(3):
        band = jnp.zeros((WH, WH), jnp.float32)
        for kx in range(3):
            shift = jnp.eye(W, W, k=1 - kx, dtype=jnp.float32)  # w_in = w_out + kx - 1
            band = band + jnp.einsum('io,wv->wivo', w3_hwio[ky, kx],
                                     shift).reshape(WH, WH)
        bands.append(band)
    w3band = jnp.stack(bands)                                    # (3, WH, WH)
    b3b = jnp.tile(b3, W).reshape(1, WH)

    # final 1x1 conv on concat([part1, part2]), split over the two branches.
    wf1 = block_diag(wf[:hid])                                   # (WH, W*Cout)
    wf2 = block_diag(wf[hid:])                                   # (WH, W*Cout)
    bfb = jnp.tile(bf, W).reshape(1, W * out_channels)

    # MXU operands stored in bf16 (f32 accumulation in-kernel); biases stay f32.
    packed = (w12.astype(jnp.bfloat16), b12,
              w3band.astype(jnp.bfloat16), b3b,
              wf1.astype(jnp.bfloat16), wf2.astype(jnp.bfloat16), bfb)
    hwio = (w1_hwio, b1, w3_hwio, b3, w2_hwio, b2, wf_hwio, bf)
    return packed, hwio


# ---------------- pure-JAX reference (for correctness check) ----------------

def csp_block_ref(x_nchw, hwio_params):
    (w1, b1, w3, b3, w2, b2, wf, bf) = hwio_params
    x = jnp.transpose(x_nchw, (0, 2, 3, 1)).astype(jnp.float32)

    def cb(x, w, b, pad):
        y = lax.conv_general_dilated(
            x, w, (1, 1), [(pad, pad), (pad, pad)],
            dimension_numbers=("NHWC", "HWIO", "NHWC"),
            precision=lax.Precision.HIGHEST)
        y = y + b
        return jnp.where(y > 0, y, 0.1 * y)

    x1 = cb(x, w1, b1, 0)
    x1 = cb(x1, w3, b3, 1)
    x2 = cb(x, w2, b2, 0)
    cat = jnp.concatenate([x1, x2], axis=-1)
    out = cb(cat, wf, bf, 0)
    return jnp.transpose(out, (0, 3, 1, 2))


if __name__ == "__main__":
    N, Cin, Cout, H, W = 2, 4, 8, 16, 16
    key = jax.random.PRNGKey(0)
    kx_, kp = jax.random.split(key)
    x = jax.random.normal(kx_, (N, Cin, H, W), jnp.float32)  # NCHW like PyTorch

    packed_params, hwio_params = make_csp_params(kp, Cin, Cout, W)

    out = jax.block_until_ready(csp_block_pallas(x, packed_params))
    ref = jax.block_until_ready(csp_block_ref(x, hwio_params))

    assert out.shape == (N, Cout, H, W), out.shape
    max_err = float(jnp.max(jnp.abs(out - ref)))
    assert jnp.allclose(out, ref, rtol=3e-2, atol=3e-2), max_err

    print("KERNEL_OK")
</pallas_src>

<mosaic_0001>
module attributes {stable_mosaic.version = 11 : i64} {
  func.func @_csp_kernel(%arg0: i32, %arg1: memref<1x16x128xf32, #tpu.memory_space<vmem>>, %arg2: memref<128x128xbf16, #tpu.memory_space<vmem>>, %arg3: memref<1x128xf32, #tpu.memory_space<vmem>>, %arg4: memref<3x64x64xbf16, #tpu.memory_space<vmem>>, %arg5: memref<1x64xf32, #tpu.memory_space<vmem>>, %arg6: memref<64x128xbf16, #tpu.memory_space<vmem>>, %arg7: memref<64x128xbf16, #tpu.memory_space<vmem>>, %arg8: memref<1x128xf32, #tpu.memory_space<vmem>>, %arg9: memref<1x16x128xf32, #tpu.memory_space<vmem>>) attributes {dimension_semantics = [#tpu.dimension_semantics<parallel>], iteration_bounds = array<i64: 2>, scalar_prefetch = 0 : i64, scratch_operands = 0 : i64, tpu.core_type = #tpu.core_type<tc>, window_params = [{transform_indices = @transform_0, window_bounds = array<i64: 1, 16, 128>}, {pipeline_mode = #tpu.pipeline_mode<synchronous>, transform_indices = @transform_1, window_bounds = array<i64: 128, 128>}, {pipeline_mode = #tpu.pipeline_mode<synchronous>, transform_indices = @transform_2, window_bounds = array<i64: 1, 128>}, {pipeline_mode = #tpu.pipeline_mode<synchronous>, transform_indices = @transform_3, window_bounds = array<i64: 3, 64, 64>}, {pipeline_mode = #tpu.pipeline_mode<synchronous>, transform_indices = @transform_4, window_bounds = array<i64: 1, 64>}, {pipeline_mode = #tpu.pipeline_mode<synchronous>, transform_indices = @transform_5, window_bounds = array<i64: 64, 128>}, {pipeline_mode = #tpu.pipeline_mode<synchronous>, transform_indices = @transform_6, window_bounds = array<i64: 64, 128>}, {pipeline_mode = #tpu.pipeline_mode<synchronous>, transform_indices = @transform_7, window_bounds = array<i64: 1, 128>}, {transform_indices = @transform_8, window_bounds = array<i64: 1, 16, 128>}]} {
    %c0 = arith.constant 0 : index
    %c0_0 = arith.constant 0 : index
    %c0_1 = arith.constant 0 : index
    %0 = vector.load %arg1[%c0, %c0_0, %c0_1] : memref<1x16x128xf32, #tpu.memory_space<vmem>>, vector<1x16x128xf32>
    %1 = vector.shape_cast %0 : vector<1x16x128xf32> to vector<16x128xf32>
    %2 = arith.truncf %1 : vector<16x128xf32> to vector<16x128xbf16>
    %c0_2 = arith.constant 0 : index
    %c0_3 = arith.constant 0 : index
    %3 = vector.load %arg2[%c0_2, %c0_3] : memref<128x128xbf16, #tpu.memory_space<vmem>>, vector<128x128xbf16>
    %cst = arith.constant dense<0.000000e+00> : vector<16x128xf32>
    %4 = tpu.matmul %2, %3, %cst {dimension_numbers = #tpu.dot_dimension_numbers<[1], [0], [0], [1], [0, 0, 1, 1], [], []>} : vector<16x128xbf16>, vector<128x128xbf16>, vector<16x128xf32> -> vector<16x128xf32>
    %c0_4 = arith.constant 0 : index
    %c0_5 = arith.constant 0 : index
    %5 = vector.load %arg3[%c0_4, %c0_5] : memref<1x128xf32, #tpu.memory_space<vmem>>, vector<1x128xf32>
    %6 = vector.broadcast %5 : vector<1x128xf32> to vector<16x128xf32>
    %7 = arith.addf %4, %6 : vector<16x128xf32>
    %cst_6 = arith.constant 0.000000e+00 : f32
    %8 = vector.broadcast %cst_6 : f32 to vector<16x128xf32>
    %9 = arith.cmpf ogt, %7, %8 : vector<16x128xf32>
    %cst_7 = arith.constant 1.000000e-01 : f32
    %10 = vector.broadcast %cst_7 : f32 to vector<16x128xf32>
    %11 = arith.mulf %10, %7 : vector<16x128xf32>
    %12 = arith.select %9, %7, %11 : vector<16x128xi1>, vector<16x128xf32>
    %13 = vector.extract_strided_slice %12 {offsets = [0, 0], sizes = [16, 64], strides = [1, 1]} : vector<16x128xf32> to vector<16x64xf32>
    %14 = vector.extract_strided_slice %12 {offsets = [0, 64], sizes = [16, 64], strides = [1, 1]} : vector<16x128xf32> to vector<16x64xf32>
    %15 = tpu.iota {dimensions = array<i32: 0>} : vector<16x1xi32>
    %c16_i32 = arith.constant 16 : i32
    %c0_i32 = arith.constant 0 : i32
    %16 = arith.cmpi eq, %c16_i32, %c0_i32 : i32
    %c1_i32 = arith.constant 1 : i32
    %17 = arith.select %16, %c1_i32, %c16_i32 : i32
    %18 = vector.broadcast %17 : i32 to vector<16x1xi32>
    %19 = arith.remsi %15, %18 : vector<16x1xi32>
    %c0_i32_8 = arith.constant 0 : i32
    %20 = vector.broadcast %c0_i32_8 : i32 to vector<16x1xi32>
    %21 = arith.cmpi ne, %19, %20 : vector<16x1xi32>
    %c0_i32_9 = arith.constant 0 : i32
    %22 = vector.broadcast %c0_i32_9 : i32 to vector<16x1xi32>
    %23 = arith.cmpi slt, %19, %22 : vector<16x1xi32>
    %c0_i32_10 = arith.constant 0 : i32
    %24 = arith.cmpi slt, %17, %c0_i32_10 : i32
    %25 = vector.broadcast %24 : i1 to vector<16x1xi1>
    %26 = vector.broadcast %25 : vector<16x1xi1> to vector<16x1xi1>
    %27 = arith.xori %23, %26 : vector<16x1xi1>
    %28 = arith.andi %27, %21 : vector<16x1xi1>
    %29 = vector.broadcast %17 : i32 to vector<16x1xi32>
    %30 = arith.addi %19, %29 : vector<16x1xi32>
    %31 = arith.select %28, %30, %19 : vector<16x1xi1>, vector<16x1xi32>
    %32 = arith.truncf %13 : vector<16x64xf32> to vector<16x64xbf16>
    %c1 = arith.constant 1 : index
    %c0_11 = arith.constant 0 : index
    %c0_12 = arith.constant 0 : index
    %33 = vector.load %arg4[%c1, %c0_11, %c0_12] : memref<3x64x64xbf16, #tpu.memory_space<vmem>>, vector<1x64x64xbf16>
    %34 = vector.shape_cast %33 : vector<1x64x64xbf16> to vector<64x64xbf16>
    %cst_13 = arith.constant dense<0.000000e+00> : vector<16x64xf32>
    %35 = tpu.matmul %32, %34, %cst_13 {dimension_numbers = #tpu.dot_dimension_numbers<[1], [0], [0], [1], [0, 0, 1, 1], [], []>} : vector<16x64xbf16>, vector<64x64xbf16>, vector<16x64xf32> -> vector<16x64xf32>
    %c0_i32_14 = arith.constant 0 : i32
    %36 = vector.broadcast %c0_i32_14 : i32 to vector<16x1xi32>
    %37 = arith.cmpi sgt, %31, %36 : vector<16x1xi32>
    %c1_i32_15 = arith.constant 1 : i32
    %38 = tpu.dynamic_rotate %13 by %c1_i32_15 dim 0 : vector<16x64xf32>, i32 -> vector<16x64xf32>
    %cst_16 = arith.constant 0.000000e+00 : f32
    %39 = vector.shape_cast %37 : vector<16x1xi1> to vector<16x1xi1>
    %40 = vector.broadcast %39 : vector<16x1xi1> to vector<16x64xi1>
    %41 = vector.broadcast %cst_16 : f32 to vector<16x64xf32>
    %42 = arith.select %40, %38, %41 : vector<16x64xi1>, vector<16x64xf32>
    %43 = arith.truncf %42 : vector<16x64xf32> to vector<16x64xbf16>
    %c0_17 = arith.constant 0 : index
    %c0_18 = arith.constant 0 : index
    %c0_19 = arith.constant 0 : index
    %44 = vector.load %arg4[%c0_17, %c0_18, %c0_19] : memref<3x64x64xbf16, #tpu.memory_space<vmem>>, vector<1x64x64xbf16>
    %45 = vector.shape_cast %44 : vector<1x64x64xbf16> to vector<64x64xbf16>
    %cst_20 = arith.constant dense<0.000000e+00> : vector<16x64xf32>
    %46 = tpu.matmul %43, %45, %cst_20 {dimension_numbers = #tpu.dot_dimension_numbers<[1], [0], [0], [1], [0, 0, 1, 1], [], []>} : vector<16x64xbf16>, vector<64x64xbf16>, vector<16x64xf32> -> vector<16x64xf32>
    %47 = arith.addf %35, %46 : vector<16x64xf32>
    %c15_i32 = arith.constant 15 : i32
    %48 = vector.broadcast %c15_i32 : i32 to vector<16x1xi32>
    %49 = arith.cmpi slt, %31, %48 : vector<16x1xi32>
    %c15_i32_21 = arith.constant 15 : i32
    %50 = tpu.dynamic_rotate %13 by %c15_i32_21 dim 0 : vector<16x64xf32>, i32 -> vector<16x64xf32>
    %cst_22 = arith.constant 0.000000e+00 : f32
    %51 = vector.shape_cast %49 : vector<16x1xi1> to vector<16x1xi1>
    %52 = vector.broadcast %51 : vector<16x1xi1> to vector<16x64xi1>
    %53 = vector.broadcast %cst_22 : f32 to vector<16x64xf32>
    %54 = arith.select %52, %50, %53 : vector<16x64xi1>, vector<16x64xf32>
    %55 = arith.truncf %54 : vector<16x64xf32> to vector<16x64xbf16>
    %c2 = arith.constant 2 : index
    %c0_23 = arith.constant 0 : index
    %c0_24 = arith.constant 0 : index
    %56 = vector.load %arg4[%c2, %c0_23, %c0_24] : memref<3x64x64xbf16, #tpu.memory_space<vmem>>, vector<1x64x64xbf16>
    %57 = vector.shape_cast %56 : vector<1x64x64xbf16> to vector<64x64xbf16>
    %cst_25 = arith.constant dense<0.000000e+00> : vector<16x64xf32>
    %58 = tpu.matmul %55, %57, %cst_25 {dimension_numbers = #tpu.dot_dimension_numbers<[1], [0], [0], [1], [0, 0, 1, 1], [], []>} : vector<16x64xbf16>, vector<64x64xbf16>, vector<16x64xf32> -> vector<16x64xf32>
    %59 = arith.addf %47, %58 : vector<16x64xf32>
    %c0_26 = arith.constant 0 : index
    %c0_27 = arith.constant 0 : index
    %60 = vector.load %arg5[%c0_26, %c0_27] : memref<1x64xf32, #tpu.memory_space<vmem>>, vector<1x64xf32>
    %61 = vector.broadcast %60 : vector<1x64xf32> to vector<16x64xf32>
    %62 = arith.addf %59, %61 : vector<16x64xf32>
    %cst_28 = arith.constant 0.000000e+00 : f32
    %63 = vector.broadcast %cst_28 : f32 to vector<16x64xf32>
    %64 = arith.cmpf ogt, %62, %63 : vector<16x64xf32>
    %cst_29 = arith.constant 1.000000e-01 : f32
    %65 = vector.broadcast %cst_29 : f32 to vector<16x64xf32>
    %66 = arith.mulf %65, %62 : vector<16x64xf32>
    %67 = arith.select %64, %62, %66 : vector<16x64xi1>, vector<16x64xf32>
    %68 = arith.truncf %67 : vector<16x64xf32> to vector<16x64xbf16>
    %c0_30 = arith.constant 0 : index
    %c0_31 = arith.constant 0 : index
    %69 = vector.load %arg6[%c0_30, %c0_31] : memref<64x128xbf16, #tpu.memory_space<vmem>>, vector<64x128xbf16>
    %cst_32 = arith.constant dense<0.000000e+00> : vector<16x128xf32>
    %70 = tpu.matmul %68, %69, %cst_32 {dimension_numbers = #tpu.dot_dimension_numbers<[1], [0], [0], [1], [0, 0, 1, 1], [], []>} : vector<16x64xbf16>, vector<64x128xbf16>, vector<16x128xf32> -> vector<16x128xf32>
    %71 = arith.truncf %14 : vector<16x64xf32> to vector<16x64xbf16>
    %c0_33 = arith.constant 0 : index
    %c0_34 = arith.constant 0 : index
    %72 = vector.load %arg7[%c0_33, %c0_34] : memref<64x128xbf16, #tpu.memory_space<vmem>>, vector<64x128xbf16>
    %cst_35 = arith.constant dense<0.000000e+00> : vector<16x128xf32>
    %73 = tpu.matmul %71, %72, %cst_35 {dimension_numbers = #tpu.dot_dimension_numbers<[1], [0], [0], [1], [0, 0, 1, 1], [], []>} : vector<16x64xbf16>, vector<64x128xbf16>, vector<16x128xf32> -> vector<16x128xf32>
    %74 = arith.addf %70, %73 : vector<16x128xf32>
    %c0_36 = arith.constant 0 : index
    %c0_37 = arith.constant 0 : index
    %75 = vector.load %arg8[%c0_36, %c0_37] : memref<1x128xf32, #tpu.memory_space<vmem>>, vector<1x128xf32>
    %76 = vector.broadcast %75 : vector<1x128xf32> to vector<16x128xf32>
    %77 = arith.addf %74, %76 : vector<16x128xf32>
    %cst_38 = arith.constant 0.000000e+00 : f32
    %78 = vector.broadcast %cst_38 : f32 to vector<16x128xf32>
    %79 = arith.cmpf ogt, %77, %78 : vector<16x128xf32>
    %cst_39 = arith.constant 1.000000e-01 : f32
    %80 = vector.broadcast %cst_39 : f32 to vector<16x128xf32>
    %81 = arith.mulf %80, %77 : vector<16x128xf32>
    %82 = arith.select %79, %77, %81 : vector<16x128xi1>, vector<16x128xf32>
    %83 = vector.shape_cast %82 : vector<16x128xf32> to vector<1x16x128xf32>
    %c0_40 = arith.constant 0 : index
    %c0_41 = arith.constant 0 : index
    %c0_42 = arith.constant 0 : index
    %84 = vector.load %arg9[%c0_40, %c0_41, %c0_42] : memref<1x16x128xf32, #tpu.memory_space<vmem>>, vector<1x16x128xf32>
    tpu.vector_store %arg9[%c0_40, %c0_41, %c0_42], %83 {strides = array<i32>} : memref<1x16x128xf32, #tpu.memory_space<vmem>>, vector<1x16x128xf32>,
    return
  }
  func.func @transform_0(%arg0: i32) -> (i32, i32, i32) {
    %c0_i32 = arith.constant 0 : i32
    %c0_i32_0 = arith.constant 0 : i32
    %c0_i32_1 = arith.constant 0 : i32
    return %arg0, %c0_i32, %c0_i32_0 : i32, i32, i32
  }
  func.func @transform_1(%arg0: i32) -> (i32, i32) {
    %c0_i32 = arith.constant 0 : i32
    %c0_i32_0 = arith.constant 0 : i32
    %c0_i32_1 = arith.constant 0 : i32
    return %c0_i32, %c0_i32_0 : i32, i32
  }
  func.func @transform_2(%arg0: i32) -> (i32, i32) {
    %c0_i32 = arith.constant 0 : i32
    %c0_i32_0 = arith.constant 0 : i32
    %c0_i32_1 = arith.constant 0 : i32
    return %c0_i32, %c0_i32_0 : i32, i32
  }
  func.func @transform_3(%arg0: i32) -> (i32, i32, i32) {
    %c0_i32 = arith.constant 0 : i32
    %c0_i32_0 = arith.constant 0 : i32
    %c0_i32_1 = arith.constant 0 : i32
    %c0_i32_2 = arith.constant 0 : i32
    return %c0_i32, %c0_i32_0, %c0_i32_1 : i32, i32, i32
  }
  func.func @transform_4(%arg0: i32) -> (i32, i32) {
    %c0_i32 = arith.constant 0 : i32
    %c0_i32_0 = arith.constant 0 : i32
    %c0_i32_1 = arith.constant 0 : i32
    return %c0_i32, %c0_i32_0 : i32, i32
  }
  func.func @transform_5(%arg0: i32) -> (i32, i32) {
    %c0_i32 = arith.constant 0 : i32
    %c0_i32_0 = arith.constant 0 : i32
    %c0_i32_1 = arith.constant 0 : i32
    return %c0_i32, %c0_i32_0 : i32, i32
  }
  func.func @transform_6(%arg0: i32) -> (i32, i32) {
    %c0_i32 = arith.constant 0 : i32
    %c0_i32_0 = arith.constant 0 : i32
    %c0_i32_1 = arith.constant 0 : i32
    return %c0_i32, %c0_i32_0 : i32, i32
  }
  func.func @transform_7(%arg0: i32) -> (i32, i32) {
    %c0_i32 = arith.constant 0 : i32
    %c0_i32_0 = arith.constant 0 : i32
    %c0_i32_1 = arith.constant 0 : i32
    return %c0_i32, %c0_i32_0 : i32, i32
  }
  func.func @transform_8(%arg0: i32) -> (i32, i32, i32) {
    %c0_i32 = arith.constant 0 : i32
    %c0_i32_0 = arith.constant 0 : i32
    %c0_i32_1 = arith.constant 0 : i32
    return %arg0, %c0_i32, %c0_i32_0 : i32, i32, i32
  }
}

</mosaic_0001>

<bundles_post_ra>
// kernel: tpu_custom_call.1
= control target key start
LH: loop header
LB: loop body
LE: loop exit
PB: predicated region body
PF: predicated region fallthrough
CT: control target
= control target key end

     0   :  { %13 = vsyncpa [#allocation3], 0  ;;  %s2045_s0 = inlined_call_operand.hbm [shape: f32[2,16,128], index: 0, kind: input, shape index: {}]   ;;  %s2046_s1 = inlined_call_operand.hbm [shape: bf16[128,128], index: 1, kind: input, shape index: {}]   ;;  %s2047_s2 = inlined_call_operand.vmem [shape: f32[1,128], index: 2, kind: input, shape index: {}]   ;;  %s2048_s3 = inlined_call_operand.hbm [shape: bf16[3,64,64], index: 3, kind: input, shape index: {}]   ;;  %s2049_s4 = inlined_call_operand.vmem [shape: f32[1,64], index: 4, kind: input, shape index: {}]   ;;  %s2050_s5 = inlined_call_operand.hbm [shape: bf16[64,128], index: 5, kind: input, shape index: {}]   ;;  %s2051_s6 = inlined_call_operand.hbm [shape: bf16[64,128], index: 6, kind: input, shape index: {}]   ;;  %s2052_s7 = inlined_call_operand.vmem [shape: f32[1,128], index: 7, kind: input, shape index: {}]   ;;  %s2053_s8 = inlined_call_operand.hbm [shape: f32[2,16,128], index: 8, kind: output, shape index: {}]  }
   0x1   :  { %15 = vsyncpa [#allocation3 + $0x1], 0 }
   0x2   :  { %16 = vsyncpa [#allocation6], 0 }
   0x3   :  { %17 = vsyncpa [#allocation9], 0 }
   0x4   :  { %18 = vsyncpa [#allocation4], 0 }
   0x5   :  { %20 = vsyncpa [#allocation4 + $0x1], 0  ;;  %s1682_s27 = smov 0   ;;  %s1684_s28 = smov 0  }
   0x6   :  { %s1686_s29 = smov 0   ;;  %s1688_s30 = smov 0  }
   0x7 LB: > { %2059 = sst [smem:[#allocation16_spill]] %s1608_s27  ;;  %s1703_s9 = sadd.s32 4294967295, %s1620_s30   ;;  %s1620_s30 = sphi %s1688_s30, %s2086_s30   ;;  %s1616_s29 = sphi %s1686_s29, %s2085_s29   ;;  %s1612_s28 = sphi %s1684_s28, %s2084_s28   ;;  %s1608_s27 = sphi %s1682_s27, %s2083_s27  }
   0x8   : > { %s1106_s10 = sadd.s32 4294967294, %s1620_s30   ;;  %p46_p0 = scmp.ne.s32.totalorder %s1612_s28, %s1608_s27 }
   0x9   : > { %p2054_p1 = scmp.eq.s32.totalorder %s1703_s9, 0  ;;  %p223_p3 = scmp.eq.s32.totalorder %s1106_s10, 1 }
   0xa   : > { %p1107_p5 = scmp.ge.s32.totalorder %s1620_s30, 1  ;;  %p230_p7 = scmp.lt.s32.totalorder %s1620_s30, 3 }
   0xb   : > { %p1712_p4 = por %p2054_p1, %p46_p0  ;;  %p1717_p6 = por %p223_p3, %p46_p0 }
   0xc   : > { %p1722_p8 = pnand %p1107_p5, %p230_p7  ;;  %s1622_s14 = smov [#allocation5]  }
   0xd   : > { %s2060_s11 = scalar_select %p1712_p4, 1, 0 }
   0xe   : > { %s2061_s12 = scalar_select %p1717_p6, 1, 0 }
   0xf   : > { %s2063_s13 = scalar_select %p1722_p8, 1, 0 }
  0x10   : > { %2062 = sst [smem:[#allocation17_spill]] %s2061_s12  ;;  %s242_s15 = sshll.u32 %s1622_s14, 4  ;;  %s1726_s15 = int_to_ptr.vmem [resolvable:$true] %s242_s15 }
  0x11   : > { %p1300_p9 = pneg %p1722_p8  ;;  %s1623_s17 = smov [#allocation8]  }
  0x12   : > { %s274_s18 = sshll.u32 %s1623_s17, 4  ;;  %s1624_s19 = smov [#allocation7]   ;;  %s1737_s18 = int_to_ptr.vmem [resolvable:$true] %s274_s18 }
  0x13   : > { %p1733_p11 = pnand %p1300_p9, %p2054_p1  ;;  %s1739_s20 = sshll.u32 %s1624_s19, 4  ;;  %s259_s20 = int_to_ptr.vmem [resolvable:$true] %s1739_s20 }
  0x14   : > { %s1404_s23 = scalar_lea.hbm %s2046_s1, 1024 }
  0x15   : > { %p1405_p12 = scmp.ne.s32.totalorder %s2046_s1, %s1404_s23  ;;  %p1749_p13 = pneg %p1733_p11 }
  0x16   : > { %p1411_p5 = scmp.lt.u32.totalorder %s1404_s23, %s2046_s1 }
  0x17   : > { %p1407_p0 = pnand %p1749_p13, %p1405_p12 }
  0x19   : > { %p1408_p3 = pneg %p1407_p0 }
  0x1b   : > { %p1413_p7 = pnand %p1411_p5, %p1408_p3 }
  0x1d   : > { %1416 = shalt.err (!%p1413_p7)
}
  0x1e   : > { %s1417_s17 = scalar_lea.vmem %s1726_s15, 1024  ;;  %p1425_p2 = scmp.lt.s32.totalorder %s1726_s15, %s1726_s15 }
  0x1f   : > { %p1418_p9 = scmp.ne.s32.totalorder %s1726_s15, %s1417_s17  ;;  %p1426_p6 = scmp.lt.s32.totalorder %s1417_s17, %s1417_s17 }
  0x21   : > { %p1420_p10 = pnand %p1418_p9, %p1749_p13  ;;  %p1427_p12 = por %p1426_p6, %p1425_p2 }
  0x23   : > { %p1421_p1 = pneg %p1420_p10 }
  0x25   : > { %p1428_p0 = pnand %p1427_p12, %p1421_p1 }
  0x27   : > { %1431 = shalt.err (!%p1428_p0)
}
  0x28   : > { %s1625_s19 = smov 64   ;;  %s1626_s21 = smov 4  }
  0x29   : > { %1303 = dma.hbm_to_vmem [thread:$0]  (!%p1733_p11), %s2046_s1, 1024, %s1726_s15, [#allocation6], %s1625_s19, %s1625_s19, %s1626_s21  }
  0x2a   : > { %s1432_s10 = scalar_lea.hbm %s2050_s5, 512 }
  0x2b   : > { %p1433_p1 = scmp.ne.s32.totalorder %s2050_s5, %s1432_s10  ;;  %p1439_p10 = scmp.lt.u32.totalorder %s1432_s10, %s2050_s5 }
  0x2d   : > { %p1435_p2 = pnand %p1433_p1, %p1749_p13 }
  0x2f   : > { %p1436_p6 = pneg %p1435_p2 }
  0x31   : > { %p1441_p3 = pnand %p1439_p10, %p1436_p6 }
  0x33   : > { %1444 = shalt.err (!%p1441_p3)
}
  0x34   : > { %s1445_s15 = scalar_lea.vmem %s1737_s18, 512  ;;  %p1453_p12 = scmp.lt.s32.totalorder %s1737_s18, %s1737_s18 }
  0x35   : > { %p1446_p5 = scmp.ne.s32.totalorder %s1737_s18, %s1445_s15  ;;  %p1454_p0 = scmp.lt.s32.totalorder %s1445_s15, %s1445_s15 }
  0x37   : > { %p1448_p7 = pnand %p1446_p5, %p1749_p13  ;;  %p1455_p1 = por %p1454_p0, %p1453_p12 }
  0x39   : > { %p1449_p9 = pneg %p1448_p7 }
  0x3b   : > { %p1456_p2 = pnand %p1455_p1, %p1449_p9 }
  0x3d   : > { %1459 = shalt.err (!%p1456_p2)
}
  0x3e   : > { %1309 = dma.hbm_to_vmem [thread:$0]  (!%p1733_p11), %s2050_s5, 512, %s1737_s18, [#allocation9], %s1625_s19, %s1625_s19, %s1626_s21  }
  0x3f   : > { %s1460_s24 = scalar_lea.hbm %s2048_s3, 1536 }
  0x40   : > { %p1461_p6 = scmp.ne.s32.totalorder %s2048_s3, %s1460_s24  ;;  %p1467_p5 = scmp.lt.u32.totalorder %s1460_s24, %s2048_s3 }
  0x42   : > { %p1463_p10 = pnand %p1461_p6, %p1749_p13 }
  0x44   : > { %p1464_p3 = pneg %p1463_p10 }
  0x46   : > { %p1469_p7 = pnand %p1467_p5, %p1464_p3 }
  0x48   : > { %1472 = shalt.err (!%p1469_p7)
}
  0x49   : > { %s1473_s15 = scalar_lea.vmem %s259_s20, 1536  ;;  %p1481_p1 = scmp.lt.s32.totalorder %s259_s20, %s259_s20 }
  0x4a   : > { %p1474_p9 = scmp.ne.s32.totalorder %s259_s20, %s1473_s15  ;;  %p1482_p2 = scmp.lt.s32.totalorder %s1473_s15, %s1473_s15 }
  0x4c   : > { %p1476_p12 = pnand %p1474_p9, %p1749_p13  ;;  %p1483_p4 = por %p1482_p2, %p1481_p1 }
  0x4e   : > { %p1477_p0 = pneg %p1476_p12 }
  0x50   : > { %p1484_p8 = pnand %p1483_p4, %p1477_p0 }
  0x52   : > { %1487 = shalt.err (!%p1484_p8)
}
  0x53   : > { %1306 = dma.hbm_to_vmem [thread:$0]  (!%p1733_p11), %s2048_s3, 1536, %s259_s20, [#allocation6], %s1625_s19, %s1625_s19, %s1626_s21  }
  0x54   : > { %s1627_s12 = smov [#allocation10]   ;;  %s1488_s25 = scalar_lea.hbm %s2051_s6, 512 }
  0x55   : > { %s287_s22 = sshll.u32 %s1627_s12, 4  ;;  %p1489_p4 = scmp.ne.s32.totalorder %s2051_s6, %s1488_s25  ;;  %s288_s22 = int_to_ptr.vmem [resolvable:$true] %s287_s22 }
  0x56   : > { %p1495_p10 = scmp.lt.u32.totalorder %s1488_s25, %s2051_s6 }
  0x57   : > { %p1491_p8 = pnand %p1489_p4, %p1749_p13 }
  0x59   : > { %p1492_p6 = pneg %p1491_p8 }
  0x5b   : > { %p1497_p3 = pnand %p1495_p10, %p1492_p6 }
  0x5d   : > { %1500 = shalt.err (!%p1497_p3)
}
  0x5e   : > { %s1501_s20 = scalar_lea.vmem %s288_s22, 512  ;;  %p1509_p12 = scmp.lt.s32.totalorder %s288_s22, %s288_s22 }
  0x5f   : > { %p1502_p5 = scmp.ne.s32.totalorder %s288_s22, %s1501_s20  ;;  %p1510_p0 = scmp.lt.s32.totalorder %s1501_s20, %s1501_s20 }
  0x61   : > { %p1504_p7 = pnand %p1502_p5, %p1749_p13  ;;  %p1511_p1 = por %p1510_p0, %p1509_p12 }
  0x63   : > { %p1505_p9 = pneg %p1504_p7 }
  0x65   : > { %p1512_p2 = pnand %p1511_p1, %p1505_p9 }
  0x67   : > { %1515 = shalt.err (!%p1512_p2)
}
  0x68   : > { %1312 = dma.hbm_to_vmem [thread:$0]  (!%p1733_p11), %s2051_s6, 512, %s288_s22, [#allocation9], %s1625_s19, %s1625_s19, %s1626_s21  }
  0x69   : > { %s1843_s26 = sadd.s32 1, %s1620_s30   ;;  %s33_s16 = sadd.s32 1, %s1616_s29 }
  0x6a   : > { %s30_s12 = ssub.s32 %s1620_s30, %s1843_s26  ;;  %p40_p13 = scmp.ne.s32.totalorder %s1616_s29, %s1612_s28 }
  0x6b   : > { %p31_p4 = scmp.eq.s32.totalorder %s30_s12, 0  ;;  %p41_p8 = scmp.eq.s32.totalorder %s1620_s30, 0 }
  0x6c   : > { %p2066_p6 = scmp.eq.s32.totalorder %s1703_s9, 1  ;;  %p1325_p3 = scmp.lt.s32.totalorder %s1620_s30, 2 }
  0x6d   : > { %s1859_s24 = scalar_select %p31_p4, %s1616_s29, %s33_s16  }
  0x6e   : > { %p1853_p10 = por %p2066_p6, %p40_p13  ;;  %p42_p5 = por %p41_p8, %p40_p13 }
  0x6f   : > { %s304_s25 = sand.u32 1, %s1616_s29   ;;  %s1164_s19 = sshll.u32 %s1620_s30, 8 }
  0x70   : > { %s1113_s10 = sshll.u32 %s304_s25, 4  ;;  %s1866_s14 = scalar_lea.hbm %s2045_s0, %s1164_s19 }
  0x71   : > { %s308_s17 = scalar_lea.vmem [#allocation2], %s1113_s10  ;;  %p1870_p11 = pnand %p1325_p3, %p42_p5 }
  0x72   : > { %s315_s15 = sshll.u32 %s308_s17, 4  ;;  %s1874_s18 = scalar_lea.sflag [#allocation3], %s304_s25  ;;  %s1868_s15 = int_to_ptr.vmem [resolvable:$true] %s315_s15 }
  0x73   : > { %s1516_s27 = scalar_lea.hbm %s1866_s14, 256  ;;  %p1518_p9 = pneg %p1870_p11 }
  0x74   : > { %p1517_p7 = scmp.ne.s32.totalorder %s1866_s14, %s1516_s27  ;;  %s1521_s10 = scalar_lea.hbm %s2045_s0, 512 }
  0x75   : > { %p1522_p1 = scmp.lt.u32.totalorder %s1866_s14, %s2045_s0  ;;  %p1523_p2 = scmp.lt.u32.totalorder %s1521_s10, %s1516_s27 }
  0x76   : > { %p1519_p12 = pnand %p1518_p9, %p1517_p7  ;;  %p1525_p4 = scmp.lt.u32.totalorder %s1516_s27, %s1866_s14 }
  0x77   : > { %p1524_p13 = por %p1523_p2, %p1522_p1 }
  0x78   : > { %p1520_p0 = pneg %p1519_p12 }
  0x79   : > { %p1526_p8 = por %p1525_p4, %p1524_p13 }
  0x7b   : > { %p1527_p6 = pnand %p1526_p8, %p1520_p0 }
  0x7d   : > { %1530 = shalt.err (!%p1527_p6)
}
  0x7e   : > { %s1531_s25 = scalar_lea.vmem %s1868_s15, 256  ;;  %s1628_s22 = smov [#allocation2]  }
  0x7f   : > { %p1532_p3 = scmp.ne.s32.totalorder %s1868_s15, %s1531_s25  ;;  %s1536_s17 = sshll.u32 %s1628_s22, 4  ;;  %s1537_s17 = int_to_ptr.vmem [resolvable:$false] %s1536_s17 }
  0x80   : > { %s1538_s16 = scalar_lea.vmem %s1537_s17, 512  ;;  %p1539_p12 = scmp.lt.s32.totalorder %s1868_s15, %s1537_s17 }
  0x81   : > { %p1534_p5 = pnand %p1532_p3, %p1518_p9  ;;  %p1540_p1 = scmp.lt.s32.totalorder %s1538_s16, %s1531_s25 }
  0x83   : > { %p1535_p7 = pneg %p1534_p5  ;;  %p1541_p2 = por %p1540_p1, %p1539_p12 }
  0x85   : > { %p1542_p13 = pnand %p1541_p2, %p1535_p7 }
  0x87   : > { %1545 = shalt.err (!%p1542_p13)
}
  0x88   : > { %s1629_s27 = smov 128   ;;  %s1630_s12 = smov 8  }
  0x89   : > { %1316 = dma.hbm_to_vmem [thread:$0]  (!%p1870_p11), %s1866_s14, 256, %s1868_s15, %s1874_s18, %s1629_s27, %s1629_s27, %s1630_s12  }
  0x8a   : > { %p2069_p9 = scmp.ne.s32.totalorder %s2063_s13, 0 }
  0x8b   : > { %s1905_s10 = sand.u32 (!%p2069_p9), 1, %s1612_s28   ;;  %p2070_p0 = scmp.ne.s32.totalorder (!%p2069_p9), %s2060_s11, 0 }
  0x8c   : > { %327 = sbr.rel (%p2069_p9) target bundleno = 891 (0x37b), region = 52  ;;  %s1117_s19 = sshll.u32 (!%p2069_p9), %s1905_s10, 4 }
  0x8d   : > { %s330_s21 = scalar_lea.sflag (!%p2069_p9), [#allocation3], %s1905_s10  ;;  %s1911_s25 = scalar_lea.vmem (!%p2069_p9), [#allocation2], %s1117_s19 }
  0x93   : > { %1591 = dma.done.wait (%p2070_p0), %s330_s21, 256  }
  0x94   : > { %1593 = vsyncadd (%p2070_p0), %s330_s21, 4294967040  ;;  %p2071_p11 = scmp.eq.s32.totalorder %s1703_s9, 0 }
  0x96   : > { %1595 = dma.done.wait (%p2071_p11), [#allocation6], 2560   ;;  %p2072_p4 = pmov %p2071_p11 }
  0x98   : > { %1597 = vsyncadd (%p2072_p4), [#allocation6], 4294964736  ;;  %p2073_p8 = pmov %p2072_p4 }
  0x99   : > { %p2074_p6 = pmov %p2072_p4 }
  0x9a   : > { %1599 = dma.done.wait (%p2073_p8), [#allocation9], 1024  }
  0x9b   : > { %1601 = vsyncadd (%p2074_p6), [#allocation9], 4294966272  ;;  %v1631_v0 = vmov 0.0   ;;  %vm1632_vm0 = vmmov 0   ;;  %v1376_v1 = vld [vmem:[#allocation5] sm:$0xff]   ;;  %v1377_v2 = vld [vmem:[#allocation5 + $0x8] sm:$0xff]   ;;  %v504_v20 = vlaneseq }
  0x9c   : > { %1200 = vmatprep.subr.bf16.mxu0 %v1631_v0  ;;  %1216 = vmatprep.mubr.msk.bf16.mxu0 %vm1632_vm0, %v1631_v0  ;;  %v1378_v3 = vld [vmem:[#allocation5 + $0x10] sm:$0xff]   ;;  %v1384_v4 = vld [vmem:[#allocation7] sm:$0xff]   ;;  %v1379_v5 = vld [vmem:[#allocation5 + $0x18] sm:$0xff]   ;;  %s1633_s14 = smov 64   ;;  %vm587_vm7 = vcmask 523264   ;;  %s381_s17 = scalar_lea.vmem [#allocation11], %s1117_s19 }
  0x9d   : > { %1220 = vmatprep.subr.bf16.mxu1 %v1631_v0  ;;  %1228 = vmatprep.mubr.msk.bf16.mxu1 %vm1632_vm0, %v1631_v0  ;;  %v1380_v6 = vld [vmem:[#allocation5 + $0x20] sm:$0xff]   ;;  %v1381_v7 = vld [vmem:[#allocation5 + $0x28] sm:$0xff]   ;;  %v1382_v8 = vld [vmem:[#allocation5 + $0x30] sm:$0xff]   ;;  %v505_v21 = vshrl.u32 %v504_v20, 7  ;;  %s995_s16 = sshll.u32 %s381_s17, 4  ;;  %s1165_s27 = sshll.u32 %s1703_s9, 8  ;;  %s1996_s16 = int_to_ptr.vmem [resolvable:$true] %s995_s16 }
  0x9e   : > { %1201 = vmatpush3.bf16.msra.mxu0 %v1376_v1  ;;  %1221 = vmatpush3.bf16.msra.mxu1 %v1384_v4  ;;  %v1383_v9 = vld [vmem:[#allocation5 + $0x38] sm:$0xff]   ;;  %v383_v10 = vld [vmem:[%s1911_s25] sm:$0xff]  ;;  %v1386_v14 = vld [vmem:[#allocation7 + $0x8] sm:$0xff]   ;;  %s2001_s19 = scalar_lea.hbm %s2053_s8, %s1165_s27  ;;  %s982_s9 = scalar_lea.sflag [#allocation4], %s1905_s10 }
  0x9f   : > { %1202 = vmatprep.subr.bf16.mxu0 %v1631_v0  ;;  %1222 = vmatprep.subr.bf16.mxu1 %v1631_v0  ;;  %v384_v11 = vld [vmem:[%s1911_s25 + $0x8] sm:$0xff]  ;;  %v1385_v13 = vld [vmem:[#allocation7 + $0x40] sm:$0xff]   ;;  %v1388_v16 = vld [vmem:[#allocation7 + $0x10] sm:$0xff]   ;;  %v506_v23 = vadd.s32 8, %v505_v21  ;;  %v511_v32 = vand.u32 15, %v505_v21  ;;  %vm704_vm3 = vcmp.lt.s32.totalorder %v505_v21, 7 }
  0xa0   : > { %v385_v12 = vpack.c.bf16 %v384_v11, %v383_v10  ;;  %v1387_v15 = vld [vmem:[#allocation7 + $0x48] sm:$0xff]   ;;  %v1389_v17 = vld [vmem:[#allocation7 + $0x50] sm:$0xff]   ;;  %v1390_v18 = vld [vmem:[#allocation7 + $0x18] sm:$0xff]   ;;  %vm545_vm4 = vcmp.lt.s32.totalorder %v505_v21, 1  ;;  %s1546_s25 = scalar_lea.vmem %s1996_s16, 256  ;;  %s1634_s11 = smov [#allocation11]  }
  0xa1   : > { %v1391_v19 = vld [vmem:[#allocation7 + $0x58] sm:$0xff]   ;;  %v1123_v22 = vld [vmem:[%s2047_s2] ss:$0 sm:$0xff]  ;;  %v518_v28 = vand.u32 15, %v506_v23  ;;  %vm1958_vm6 = vcmp.gt.s32.totalorder %v511_v32, 0  ;;  %v1393_v52 = vld [vmem:[#allocation7 + $0x28] sm:$0xff]   ;;  %p1547_p3 = scmp.ne.s32.totalorder %s1996_s16, %s1546_s25 }
  0xa2   : > { %1203 = vmatpush3.bf16.msra.mxu0 %v1377_v2  ;;  %1223 = vmatpush3.bf16.msra.mxu1 %v1386_v14  ;;  %v1392_v49 = vld [vmem:[#allocation7 + $0x20] sm:$0xff]   ;;  %v1394_v53 = vld [vmem:[#allocation7 + $0x30] sm:$0xff]   ;;  %v1395_v54 = vld [vmem:[#allocation7 + $0x38] sm:$0xff]   ;;  %s1550_s13 = sshll.u32 %s1634_s11, 4  ;;  %s1551_s13 = int_to_ptr.vmem [resolvable:$false] %s1550_s13 }
  0xa3   : > { %1204 = vmatprep.subr.bf16.mxu0 %v1631_v0  ;;  %1224 = vmatprep.subr.bf16.mxu1 %v1631_v0  ;;  %vm1954_vm5 = vcmp.lt.s32.totalorder %v518_v28, 15  ;;  %v1396_v55 = vld [vmem:[#allocation10] sm:$0xff]   ;;  %v1397_v56 = vld [vmem:[#allocation10 + $0x8] sm:$0xff]   ;;  %v1398_v57 = vld [vmem:[#allocation10 + $0x10] sm:$0xff]   ;;  %p1548_p5 = pnand %p1547_p3, %p1853_p10  ;;  %p1553_p12 = scmp.lt.s32.totalorder %s1996_s16, %s1551_s13 }
  0xa4   : > { %v1399_v58 = vld [vmem:[#allocation10 + $0x18] sm:$0xff]   ;;  %v1400_v59 = vld [vmem:[#allocation8] sm:$0xff]   ;;  %v1401_v60 = vld [vmem:[#allocation8 + $0x8] sm:$0xff]  }
  0xa5   : > { %v1402_v61 = vld [vmem:[#allocation8 + $0x10] sm:$0xff]   ;;  %v1403_v62 = vld [vmem:[#allocation8 + $0x18] sm:$0xff]   ;;  %p1549_p7 = pneg %p1548_p5 }
  0xa6   : > { %1205 = vmatpush3.bf16.msra.mxu0 %v1378_v3  ;;  %1225 = vmatpush3.bf16.msra.mxu1 %v1388_v16 }
  0xa7   : > { %1206 = vmatprep.subr.bf16.mxu0 %v1631_v0  ;;  %1226 = vmatprep.subr.bf16.mxu1 %v1631_v0 }
  0xaa   : > { %1207 = vmatpush3.bf16.msra.mxu0 %v1379_v5  ;;  %1227 = vmatpush3.bf16.msra.mxu1 %v1390_v18 }
  0xab   : > { %1208 = vmatprep.subr.bf16.mxu0 %v1631_v0  ;;  %1232 = vmatprep.subr.bf16.mxu1 %v1631_v0 }
  0xae   : > { %1209 = vmatpush3.bf16.msra.mxu0 %v1380_v6 }
  0xaf   : > { %1210 = vmatprep.subr.bf16.mxu0 %v1631_v0 }
  0xb2   : > { %1211 = vmatpush3.bf16.msra.mxu0 %v1381_v7 }
  0xb3   : > { %1212 = vmatprep.subr.bf16.mxu0 %v1631_v0 }
  0xb6   : > { %1213 = vmatpush3.bf16.msra.mxu0 %v1382_v8 }
  0xb7   : > { %1214 = vmatprep.subr.bf16.mxu0 %v1631_v0 }
  0xba   : > { %1215 = vmatpush3.bf16.msra.mxu0 %v1383_v9 }
  0xbb   : > { %1244 = vmatprep.subr.bf16.mxu0 %v1631_v0 }
  0xbd   : > { %1217 = vmatmul.mubr.bf16.vlgmr.msra.gmra.mrb[0].mxu0 %v385_v12 }
  0xbe   : > { %1245 = vmatpush3.bf16.msra.mxu0 %v1385_v13  ;;  %1252 = vmatprep.mubr.msk.bf16.mxu0 %vm1632_vm0, %v1631_v0 }
  0xbf   : > { %1246 = vmatprep.subr.bf16.mxu0 %v1631_v0 }
  0xc2   : > { %1247 = vmatpush3.bf16.msra.mxu0 %v1387_v15 }
  0xc3   : > { %1248 = vmatprep.subr.bf16.mxu0 %v1631_v0 }
  0xc6   : > { %1249 = vmatpush3.bf16.msra.mxu0 %v1389_v17 }
  0xc7   : > { %1250 = vmatprep.subr.bf16.mxu0 %v1631_v0 }
  0xca   : > { %1251 = vmatpush3.bf16.msra.mxu0 %v1391_v19 }
  0xcb   : > { %1268 = vmatprep.subr.bf16.mxu0 %v1631_v0 }
 0x190   : > { %v491_v24 = vpop.f32.mrb[0].mxu0 }
 0x191   : > { %v492_v25 = vadd.f32 %v1123_v22, %v491_v24  ;;  %v1218_v26 = vpop.f32.mrb[1].mxu0 }
 0x192   : > { %v494_v27 = vpop.f32.mrb[2].mxu0 }
 0x193   : > { %vm498_vm1 = vcmp.gt.f32.partialorder %v492_v25, 0.0  ;;  %v500_v29 = vmul.f32 0.1, %v492_v25  ;;  %v495_v30 = vadd.f32 %v1123_v22, %v494_v27  ;;  %v1219_v31 = vpop.f32.mrb[3].mxu0 }
 0x195   : > { %vm499_vm2 = vcmp.gt.f32.partialorder %v495_v30, 0.0  ;;  %v501_v33 = vmul.f32 0.1, %v495_v30  ;;  %v502_v34 = vsel %vm498_vm1, %v492_v25, %v500_v29  ;;  %v1158_v29 = vld [vmem:[%s2052_s7] ss:$0 sm:$0xff] }
 0x196   : > { %v543_v36 = vrot.slane %v502_v34, 7  ;;  %v702_v41 = vrot.slane %v502_v34, 1 }
 0x197   : > { %v503_v35 = vsel %vm499_vm2, %v495_v30, %v501_v33 }
 0x198   : > { %v531_v39 = vpack.c.bf16 %v503_v35, %v502_v34  ;;  %v544_v40 = vrot.slane %v503_v35, 7  ;;  %v703_v42 = vrot.slane %v503_v35, 1 }
 0x19a   : > { %v705_v43 = vsel %vm704_vm3, %v702_v41, %v703_v42  ;;  %v706_v44 = vsel %vm704_vm3, %v703_v42, %v702_v41  ;;  %826 = vrot.lane.b32.xlu0 %v531_v39, %s1633_s14  ;;  %v546_v45 = vsel %vm545_vm4, %v543_v36, %v544_v40  ;;  %v547_v46 = vsel %vm545_vm4, %v544_v40, %v543_v36  ;;  %s1552_s14 = scalar_lea.vmem %s1551_s13, 512 }
 0x19b   : > { %v712_v47 = vsel %vm1954_vm5, %v706_v44, 0.0  ;;  %v552_v48 = vsel %vm1958_vm6, %v547_v46, 0.0  ;;  %p1554_p1 = scmp.lt.s32.totalorder %s1552_s14, %s1546_s25 }
 0x19c   : > { %v713_v50 = vpack.c.bf16 %v712_v47, %v705_v43  ;;  %v554_v51 = vpack.c.bf16 %v546_v45, %v552_v48 }
 0x19d   : > { %p1555_p2 = por %p1554_p1, %p1553_p12 }
 0x19e   : > { %1229 = vmatmul.mubr.msk.bf16.vlgmr.msra.gmra.mrb[0].mxu1 %vm587_vm7, %v554_v51  ;;  %1253 = vmatmul.mubr.msk.bf16.vlgmr.msra.gmra.mrb[4].mxu0 %vm587_vm7, %v713_v50 }
 0x19f   : > { %1233 = vmatpush3.bf16.msra.mxu1 %v1392_v49  ;;  %1240 = vmatprep.mubr.msk.bf16.mxu1 %vm1632_vm0, %v1631_v0  ;;  %p1556_p13 = pnand %p1555_p2, %p1549_p7 }
 0x1a0   : > { %1234 = vmatprep.subr.bf16.mxu1 %v1631_v0  ;;  %1276 = vmatprep.mubr.msk.bf16.mxu0 %vm1632_vm0, %v1631_v0 }
 0x1a1   : > { %1269 = vmatpush3.bf16.msra.mxu0 %v1400_v59 }
 0x1a2   : > { %1270 = vmatprep.subr.bf16.mxu0 %v1631_v0 }
 0x1a3   : > { %1235 = vmatpush3.bf16.msra.mxu1 %v1393_v52 }
 0x1a4   : > { %1236 = vmatprep.subr.bf16.mxu1 %v1631_v0 }
 0x1a5   : > { %1271 = vmatpush3.bf16.msra.mxu0 %v1401_v60 }
 0x1a6   : > { %1272 = vmatprep.subr.bf16.mxu0 %v1631_v0 }
 0x1a7   : > { %1237 = vmatpush3.bf16.msra.mxu1 %v1394_v53 }
 0x1a8   : > { %1238 = vmatprep.subr.bf16.mxu1 %v1631_v0 }
 0x1a9   : > { %1273 = vmatpush3.bf16.msra.mxu0 %v1402_v61 }
 0x1aa   : > { %1274 = vmatprep.subr.bf16.mxu0 %v1631_v0 }
 0x1ab   : > { %1239 = vmatpush3.bf16.msra.mxu1 %v1395_v54 }
 0x1ac   : > { %1256 = vmatprep.subr.bf16.mxu1 %v1631_v0 }
 0x1ad   : > { %1275 = vmatpush3.bf16.msra.mxu0 %v1403_v62 }
 0x1ae   : > { %1241 = vmatmul.mubr.msk.bf16.vlgmr.msra.gmra.mrb[4].mxu1 %vm587_vm7, %v531_v39 }
 0x1af   : > { %1257 = vmatpush3.bf16.msra.mxu1 %v1396_v55  ;;  %1264 = vmatprep.mubr.msk.bf16.mxu1 %vm1632_vm0, %v1631_v0 }
 0x1b0   : > { %1258 = vmatprep.subr.bf16.mxu1 %v1631_v0 }
 0x1b3   : > { %1259 = vmatpush3.bf16.msra.mxu1 %v1397_v56 }
 0x1b4   : > { %1260 = vmatprep.subr.bf16.mxu1 %v1631_v0 }
 0x1b7   : > { %1261 = vmatpush3.bf16.msra.mxu1 %v1398_v57 }
 0x1b8   : > { %1262 = vmatprep.subr.bf16.mxu1 %v1631_v0  ;;  %v1147_v0 = vld [vmem:[%s2049_s4] ss:$0 sm:$0xff] }
 0x1bb   : > { %1263 = vmatpush3.bf16.msra.mxu1 %v1399_v58 }
 0x20c   : > { %v827_v63 = vpop.permute.xlu0 %826 }
 0x20d   : > { %1265 = vmatmul.mubr.msk.bf16.vlgmr.msra.gmra.mrb[8].mxu1 %vm587_vm7, %v827_v63 }
 0x271   : > { %v625_v1 = vpop.f32.mrb[0].mxu1  ;;  %v784_v2 = vpop.f32.mrb[4].mxu0 }
 0x272   : > { %v1230_v3 = vpop.f32.mrb[1].mxu1  ;;  %v1254_v4 = vpop.f32.mrb[5].mxu0 }
 0x273   : > { %v628_v5 = vpop.f32.mrb[2].mxu1  ;;  %v787_v6 = vpop.f32.mrb[6].mxu0 }
 0x274   : > { %v1231_v7 = vpop.f32.mrb[3].mxu1  ;;  %v1255_v8 = vpop.f32.mrb[7].mxu0 }
 0x281   : > { %v693_v9 = vpop.f32.mrb[4].mxu1 }
 0x282   : > { %v694_v10 = vadd.f32 %v693_v9, %v625_v1  ;;  %v1242_v11 = vpop.f32.mrb[5].mxu1 }
 0x283   : > { %v696_v12 = vpop.f32.mrb[6].mxu1 }
 0x284   : > { %v791_v13 = vadd.f32 %v784_v2, %v694_v10  ;;  %v697_v14 = vadd.f32 %v696_v12, %v628_v5  ;;  %v1243_v15 = vpop.f32.mrb[7].mxu1 }
 0x286   : > { %v800_v16 = vadd.f32 %v1147_v0, %v791_v13  ;;  %v792_v17 = vadd.f32 %v787_v6, %v697_v14 }
 0x288   : > { %v804_v18 = vmul.f32 0.1, %v800_v16  ;;  %v801_v19 = vadd.f32 %v1147_v0, %v792_v17  ;;  %vm802_vm8 = vcmp.gt.f32.partialorder %v800_v16, 0.0 }
 0x28a   : > { %vm803_vm9 = vcmp.gt.f32.partialorder %v801_v19, 0.0  ;;  %v805_v20 = vmul.f32 0.1, %v801_v19  ;;  %v806_v21 = vsel %vm802_vm8, %v800_v16, %v804_v18 }
 0x28c   : > { %v807_v22 = vsel %vm803_vm9, %v801_v19, %v805_v20 }
 0x28d   : > { %v808_v23 = vpack.c.bf16 %v807_v22, %v806_v21 }
 0x28f   : > { %1277 = vmatmul.mubr.msk.bf16.vlgmr.msra.gmra.mrb[8].mxu0 %vm587_vm7, %v808_v23 }
 0x2e0   : > { %v889_v24 = vpop.f32.mrb[8].mxu1 }
 0x2e1   : > { %v1266_v25 = vpop.f32.mrb[9].mxu1 }
 0x2e2   : > { %v892_v26 = vpop.f32.mrb[10].mxu1 }
 0x2e3   : > { %v1267_v27 = vpop.f32.mrb[11].mxu1 }
 0x362   : > { %v957_v28 = vpop.f32.mrb[8].mxu0 }
 0x363   : > { %v958_v30 = vadd.f32 %v957_v28, %v889_v24  ;;  %v1278_v31 = vpop.f32.mrb[9].mxu0 }
 0x364   : > { %v960_v32 = vpop.f32.mrb[10].mxu0 }
 0x365   : > { %v971_v33 = vadd.f32 %v1158_v29, %v958_v30  ;;  %v961_v34 = vadd.f32 %v960_v32, %v892_v26  ;;  %v1279_v35 = vpop.f32.mrb[11].mxu0 }
 0x367   : > { %vm973_vm10 = vcmp.gt.f32.partialorder %v971_v33, 0.0  ;;  %v975_v36 = vmul.f32 0.1, %v971_v33  ;;  %v972_v37 = vadd.f32 %v1158_v29, %v961_v34 }
 0x369   : > { %v977_v38 = vsel %vm973_vm10, %v971_v33, %v975_v36  ;;  %vm974_vm11 = vcmp.gt.f32.partialorder %v972_v37, 0.0  ;;  %v976_v39 = vmul.f32 0.1, %v972_v37 }
 0x36a   : > { %979 = vst [vmem:[%s381_s17] sm:$0xff] %v977_v38 }
 0x36b   : > { %v978_v40 = vsel %vm974_vm11, %v972_v37, %v976_v39 }
 0x36c   : > { %980 = vst [vmem:[%s381_s17 + $0x8] sm:$0xff] %v978_v40 }
 0x36d   : > { %1559 = shalt.err (!%p1556_p13)
}
 0x36e   : > { %s1560_s15 = scalar_lea.hbm %s2001_s19, 256  ;;  %s1564_s22 = scalar_lea.hbm %s2053_s8, 512 }
 0x36f   : > { %p1561_p9 = scmp.ne.s32.totalorder %s2001_s19, %s1560_s15  ;;  %p1565_p4 = scmp.lt.u32.totalorder %s2001_s19, %s2053_s8 }
 0x370   : > { %p1566_p8 = scmp.lt.u32.totalorder %s1564_s22, %s1560_s15  ;;  %p1568_p3 = scmp.lt.u32.totalorder %s1560_s15, %s2001_s19 }
 0x371   : > { %p1562_p0 = pnand %p1561_p9, %p1853_p10 }
 0x372   : > { %p1567_p6 = por %p1566_p8, %p1565_p4 }
 0x373   : > { %p1563_p11 = pneg %p1562_p0 }
 0x374   : > { %p1569_p5 = por %p1568_p3, %p1567_p6 }
 0x376   : > { %p1570_p7 = pnand %p1569_p5, %p1563_p11 }
 0x378   : > { %1573 = shalt.err (!%p1570_p7)
}
 0x379   : > { %s1635_s12 = smov 128   ;;  %s1636_s21 = smov 8  }
 0x37a   : > { %1298 = dma.vmem_to_hbm [thread:$0]  (%p1853_p10), %s1996_s16, 256, %s2001_s19, %s982_s9, %s1635_s12, %s1635_s12, %s1636_s21  }
 0x37b PF: > { %s2079_s25 = sld [smem:[#allocation16_spill]]  ;;  %s2080_s11 = sld [smem:[#allocation17_spill]] }
 0x37c   : > { %p2082_p1 = scmp.ge.s32.totalorder %s1620_s30, 2 }
 0x381   : > { %s1010_s13 = sand.u32 1, %s2079_s25   ;;  %p2081_p12 = scmp.ne.s32.totalorder %s2080_s11, 0 }
 0x382   : > { %s1011_s14 = scalar_lea.sflag [#allocation4], %s1010_s13 }
 0x383   : > { %p1318_p2 = pnand %p2082_p1, %p2081_p12 }
 0x385   : > { %1603 = dma.done.wait (!%p1318_p2), %s1011_s14, 256  }
 0x386   : > { %1605 = vsyncadd (!%p1318_p2), %s1011_s14, 4294967040  ;;  %p23_p13 = scmp.ge.s32.totalorder %s1843_s26, 4   ;;  %s2083_s27 = smov %s1612_s28 }
 0x387   : > { %s2084_s28 = smov %s1616_s29  ;;  %s2085_s29 = smov %s1859_s24 }
 0x388   : > { %s2086_s30 = smov %s1843_s26  ;;  %25 = sbr.rel (!%p23_p13) target bundleno = 7 (0x7), region = 115 }
 0x38f   :  { %1016 = vsyncpa [#allocation3], 1 }
 0x390   :  { %1018 = vsyncpa [#allocation3 + $0x1], 1 }
 0x391   :  { %1019 = vsyncpa [#allocation6], 1 }
 0x392   :  { %1020 = vsyncpa [#allocation9], 1 }
 0x393   :  { %1021 = vsyncpa [#allocation4], 1 }
 0x394   :  { %1023 = vsyncpa [#allocation4 + $0x1], 1 }

</bundles_post_ra>
